<compile_context>
chip_gen: v6e
topology: v6e:2x2x1
jax: 0.10.0
libtpu: 0.0.40
codegen_flags: <defaults>
</compile_context>

<pallas_src>
import functools

import jax
import jax.numpy as jnp
from jax.experimental import pallas as pl
from jax.experimental.pallas import tpu as pltpu


def _round_up(x, m):
    return ((x + m - 1) // m) * m


def agentnet_kernel(x_ref, w1_ref, b1_ref, w2_ref, b2_ref, w3t_ref, b3t_ref, ot_ref):
    # x_ref:   (TB, Din)  bf16  -- streamed batch tile
    # w1_ref:  (Din, Hp)  bf16  -- resident (constant index_map)
    # b1_ref:  (1, Hp)    f32
    # w2_ref:  (Hp, Hp)   bf16
    # b2_ref:  (1, Hp)    f32
    # w3t_ref: (Ap, Hp)   bf16  -- transposed output head
    # b3t_ref: (Ap, 1)    f32
    # ot_ref:  (Ap, TB)   f32   -- transposed, lane-dense output tile
    x = x_ref[...]  # already bf16; no extra cast

    h1 = jnp.dot(x, w1_ref[...], preferred_element_type=jnp.float32) + b1_ref[...]
    h1 = jnp.maximum(h1, 0.0)

    h2 = jnp.dot(h1.astype(jnp.bfloat16), w2_ref[...],
                 preferred_element_type=jnp.float32) + b2_ref[...]
    h2 = jnp.maximum(h2, 0.0)

    # (Ap, Hp) x (TB, Hp) contracted over Hp -> (Ap, TB): lane axis = batch (dense store).
    out_t = jax.lax.dot_general(
        w3t_ref[...], h2.astype(jnp.bfloat16),
        dimension_numbers=(((1,), (1,)), ((), ())),
        preferred_element_type=jnp.float32) + b3t_ref[...]
    ot_ref[...] = out_t


def _prepare_params(params):
    """Pad + cast PyTorch-layout params into kernel layout (hidden->128, head transposed)."""
    w1, b1, w2, b2, w3, b3 = params
    din, hidden = w1.shape
    action_dim = w3.shape[1]
    hp = _round_up(hidden, 128)      # 64 -> 128: full 128-lane vregs / MXU columns
    ap = _round_up(action_dim, 8)    # 4 -> 8: full sublanes on the (Ap, TB) store

    f32, bf16 = jnp.float32, jnp.bfloat16
    w1p = jnp.zeros((din, hp), f32).at[:, :hidden].set(w1).astype(bf16)
    b1p = jnp.zeros((1, hp), f32).at[0, :hidden].set(b1)           # zero-padded bias
    w2p = jnp.zeros((hp, hp), f32).at[:hidden, :hidden].set(w2).astype(bf16)
    b2p = jnp.zeros((1, hp), f32).at[0, :hidden].set(b2)
    w3tp = jnp.zeros((ap, hp), f32).at[:action_dim, :hidden].set(w3.T).astype(bf16)
    b3tp = jnp.zeros((ap, 1), f32).at[:action_dim, 0].set(b3)
    return (w1p, b1p, w2p, b2p, w3tp, b3tp), action_dim


@functools.partial(jax.jit, static_argnames=("block_rows",))
def agentnet_forward(x, params, *, block_rows=1024):
    """AgentNet forward. x: (B, input_dim) f32 -> (B, action_dim) f32."""
    (w1, b1, w2, b2, w3t, b3t), action_dim = _prepare_params(params)
    B, din = x.shape
    ap = w3t.shape[0]

    # Batch tile: multiple of 128 (lane-dense transposed store), capped at block_rows.
    tb = min(block_rows, _round_up(B, 128))
    bp = _round_up(B, tb)

    xb = x
    if bp != B:
        xb = jnp.pad(xb, ((0, bp - B), (0, 0)))
    xb = xb.astype(jnp.bfloat16)

    out_t = pl.pallas_call(
        agentnet_kernel,
        out_shape=jax.ShapeDtypeStruct((ap, bp), jnp.float32),
        grid=(bp // tb,),
        in_specs=[
            pl.BlockSpec((tb, din), lambda i: (i, 0)),       # streamed x tile
            pl.BlockSpec(w1.shape, lambda i: (0, 0)),        # resident weights/biases
            pl.BlockSpec(b1.shape, lambda i: (0, 0)),
            pl.BlockSpec(w2.shape, lambda i: (0, 0)),
            pl.BlockSpec(b2.shape, lambda i: (0, 0)),
            pl.BlockSpec(w3t.shape, lambda i: (0, 0)),
            pl.BlockSpec(b3t.shape, lambda i: (0, 0)),
        ],
        out_specs=pl.BlockSpec((ap, tb), lambda i: (0, i)),  # lane-dense along batch
        compiler_params=pltpu.CompilerParams(
            dimension_semantics=("parallel",),               # v7x: 2 TCs split the batch
        ),
    )(xb, w1, b1, w2, b2, w3t, b3t)

    return out_t[:action_dim, :B].T


def init_params(key, input_dim, action_dim, hidden=64):
    # PyTorch nn.Linear default init: U(-1/sqrt(fan_in), 1/sqrt(fan_in)) for W and b.
    ks = jax.random.split(key, 6)

    def lin(kw, kb, fan_in, fan_out):
        bound = 1.0 / jnp.sqrt(jnp.float32(fan_in))
        w = jax.random.uniform(kw, (fan_in, fan_out), jnp.float32, -bound, bound)
        b = jax.random.uniform(kb, (fan_out,), jnp.float32, -bound, bound)
        return w, b

    w1, b1 = lin(ks[0], ks[1], input_dim, hidden)
    w2, b2 = lin(ks[2], ks[3], hidden, hidden)
    w3, b3 = lin(ks[4], ks[5], hidden, action_dim)
    return (w1, b1, w2, b2, w3, b3)


def reference_forward(x, params):
    w1, b1, w2, b2, w3, b3 = params
    h1 = jnp.maximum(x @ w1 + b1, 0.0)
    h2 = jnp.maximum(h1 @ w2 + b2, 0.0)
    return h2 @ w3 + b3


def reference_forward_bf16(x, params):
    # Same arithmetic as the kernel: bf16 matmul inputs, f32 accumulate / epilogue.
    bf = jnp.bfloat16
    w1, b1, w2, b2, w3, b3 = params
    h1 = jnp.maximum(
        jnp.dot(x.astype(bf), w1.astype(bf), preferred_element_type=jnp.float32) + b1, 0.0)
    h2 = jnp.maximum(
        jnp.dot(h1.astype(bf), w2.astype(bf), preferred_element_type=jnp.float32) + b2, 0.0)
    return jnp.dot(h2.astype(bf), w3.astype(bf), preferred_element_type=jnp.float32) + b3


if __name__ == "__main__":
    key = jax.random.PRNGKey(0)
    k_x, k_p = jax.random.split(key)

    batch, input_dim, action_dim = 8, 16, 4
    x = jax.random.normal(k_x, (batch, input_dim), jnp.float32)
    params = init_params(k_p, input_dim, action_dim)

    out = jax.block_until_ready(agentnet_forward(x, params))
    assert out.shape == (batch, action_dim), out.shape

    ref_bf16 = reference_forward_bf16(x, params)
    ref_f32 = reference_forward(x, params)
    assert jnp.allclose(out, ref_bf16, atol=5e-3, rtol=5e-3), \
        float(jnp.max(jnp.abs(out - ref_bf16)))
    assert jnp.allclose(out, ref_f32, atol=3e-2, rtol=3e-2), \
        float(jnp.max(jnp.abs(out - ref_f32)))

    print("KERNEL_OK")
</pallas_src>

<mosaic_0001>
module attributes {stable_mosaic.version = 11 : i64} {
  func.func @agentnet_kernel(%arg0: i32, %arg1: memref<128x16xbf16, #tpu.memory_space<vmem>>, %arg2: memref<16x128xbf16, #tpu.memory_space<vmem>>, %arg3: memref<1x128xf32, #tpu.memory_space<vmem>>, %arg4: memref<128x128xbf16, #tpu.memory_space<vmem>>, %arg5: memref<1x128xf32, #tpu.memory_space<vmem>>, %arg6: memref<8x128xbf16, #tpu.memory_space<vmem>>, %arg7: memref<8x1xf32, #tpu.memory_space<vmem>>, %arg8: memref<8x128xf32, #tpu.memory_space<vmem>>) attributes {dimension_semantics = [#tpu.dimension_semantics<parallel>], iteration_bounds = array<i64: 1>, scalar_prefetch = 0 : i64, scratch_operands = 0 : i64, tpu.core_type = #tpu.core_type<tc>, window_params = [{transform_indices = @transform_0, window_bounds = array<i64: 128, 16>}, {pipeline_mode = #tpu.pipeline_mode<synchronous>, transform_indices = @transform_1, window_bounds = array<i64: 16, 128>}, {pipeline_mode = #tpu.pipeline_mode<synchronous>, transform_indices = @transform_2, window_bounds = array<i64: 1, 128>}, {pipeline_mode = #tpu.pipeline_mode<synchronous>, transform_indices = @transform_3, window_bounds = array<i64: 128, 128>}, {pipeline_mode = #tpu.pipeline_mode<synchronous>, transform_indices = @transform_4, window_bounds = array<i64: 1, 128>}, {pipeline_mode = #tpu.pipeline_mode<synchronous>, transform_indices = @transform_5, window_bounds = array<i64: 8, 128>}, {pipeline_mode = #tpu.pipeline_mode<synchronous>, transform_indices = @transform_6, window_bounds = array<i64: 8, 1>}, {transform_indices = @transform_7, window_bounds = array<i64: 8, 128>}]} {
    %c0 = arith.constant 0 : index
    %c0_0 = arith.constant 0 : index
    %0 = vector.load %arg1[%c0, %c0_0] : memref<128x16xbf16, #tpu.memory_space<vmem>>, vector<128x16xbf16>
    %c0_1 = arith.constant 0 : index
    %c0_2 = arith.constant 0 : index
    %1 = vector.load %arg2[%c0_1, %c0_2] : memref<16x128xbf16, #tpu.memory_space<vmem>>, vector<16x128xbf16>
    %cst = arith.constant dense<0.000000e+00> : vector<128x128xf32>
    %2 = tpu.matmul %0, %1, %cst {dimension_numbers = #tpu.dot_dimension_numbers<[1], [0], [0], [1], [0, 0, 1, 1], [], []>} : vector<128x16xbf16>, vector<16x128xbf16>, vector<128x128xf32> -> vector<128x128xf32>
    %c0_3 = arith.constant 0 : index
    %c0_4 = arith.constant 0 : index
    %3 = vector.load %arg3[%c0_3, %c0_4] : memref<1x128xf32, #tpu.memory_space<vmem>>, vector<1x128xf32>
    %4 = vector.broadcast %3 : vector<1x128xf32> to vector<128x128xf32>
    %5 = arith.addf %2, %4 : vector<128x128xf32>
    %cst_5 = arith.constant 0.000000e+00 : f32
    %6 = vector.broadcast %cst_5 : f32 to vector<128x128xf32>
    %7 = arith.maximumf %5, %6 : vector<128x128xf32>
    %8 = arith.truncf %7 : vector<128x128xf32> to vector<128x128xbf16>
    %c0_6 = arith.constant 0 : index
    %c0_7 = arith.constant 0 : index
    %9 = vector.load %arg4[%c0_6, %c0_7] : memref<128x128xbf16, #tpu.memory_space<vmem>>, vector<128x128xbf16>
    %cst_8 = arith.constant dense<0.000000e+00> : vector<128x128xf32>
    %10 = tpu.matmul %8, %9, %cst_8 {dimension_numbers = #tpu.dot_dimension_numbers<[1], [0], [0], [1], [0, 0, 1, 1], [], []>} : vector<128x128xbf16>, vector<128x128xbf16>, vector<128x128xf32> -> vector<128x128xf32>
    %c0_9 = arith.constant 0 : index
    %c0_10 = arith.constant 0 : index
    %11 = vector.load %arg5[%c0_9, %c0_10] : memref<1x128xf32, #tpu.memory_space<vmem>>, vector<1x128xf32>
    %12 = vector.broadcast %11 : vector<1x128xf32> to vector<128x128xf32>
    %13 = arith.addf %10, %12 : vector<128x128xf32>
    %cst_11 = arith.constant 0.000000e+00 : f32
    %14 = vector.broadcast %cst_11 : f32 to vector<128x128xf32>
    %15 = arith.maximumf %13, %14 : vector<128x128xf32>
    %c0_12 = arith.constant 0 : index
    %c0_13 = arith.constant 0 : index
    %16 = vector.load %arg6[%c0_12, %c0_13] : memref<8x128xbf16, #tpu.memory_space<vmem>>, vector<8x128xbf16>
    %17 = arith.truncf %15 : vector<128x128xf32> to vector<128x128xbf16>
    %cst_14 = arith.constant dense<0.000000e+00> : vector<8x128xf32>
    %18 = tpu.matmul %16, %17, %cst_14 {dimension_numbers = #tpu.dot_dimension_numbers<[1], [1], [0], [0], [0, 0, 1, 0], [], []>} : vector<8x128xbf16>, vector<128x128xbf16>, vector<8x128xf32> -> vector<8x128xf32>
    %c0_15 = arith.constant 0 : index
    %c0_16 = arith.constant 0 : index
    %19 = vector.load %arg7[%c0_15, %c0_16] : memref<8x1xf32, #tpu.memory_space<vmem>>, vector<8x1xf32>
    %20 = vector.broadcast %19 : vector<8x1xf32> to vector<8x128xf32>
    %21 = arith.addf %18, %20 : vector<8x128xf32>
    %c0_17 = arith.constant 0 : index
    %c0_18 = arith.constant 0 : index
    %22 = vector.load %arg8[%c0_17, %c0_18] : memref<8x128xf32, #tpu.memory_space<vmem>>, vector<8x128xf32>
    tpu.vector_store %arg8[%c0_17, %c0_18], %21 {strides = array<i32>} : memref<8x128xf32, #tpu.memory_space<vmem>>, vector<8x128xf32>,
    return
  }
  func.func @transform_0(%arg0: i32) -> (i32, i32) {
    %c0_i32 = arith.constant 0 : i32
    %c0_i32_0 = arith.constant 0 : i32
    return %arg0, %c0_i32 : i32, i32
  }
  func.func @transform_1(%arg0: i32) -> (i32, i32) {
    %c0_i32 = arith.constant 0 : i32
    %c0_i32_0 = arith.constant 0 : i32
    %c0_i32_1 = arith.constant 0 : i32
    return %c0_i32, %c0_i32_0 : i32, i32
  }
  func.func @transform_2(%arg0: i32) -> (i32, i32) {
    %c0_i32 = arith.constant 0 : i32
    %c0_i32_0 = arith.constant 0 : i32
    %c0_i32_1 = arith.constant 0 : i32
    return %c0_i32, %c0_i32_0 : i32, i32
  }
  func.func @transform_3(%arg0: i32) -> (i32, i32) {
    %c0_i32 = arith.constant 0 : i32
    %c0_i32_0 = arith.constant 0 : i32
    %c0_i32_1 = arith.constant 0 : i32
    return %c0_i32, %c0_i32_0 : i32, i32
  }
  func.func @transform_4(%arg0: i32) -> (i32, i32) {
    %c0_i32 = arith.constant 0 : i32
    %c0_i32_0 = arith.constant 0 : i32
    %c0_i32_1 = arith.constant 0 : i32
    return %c0_i32, %c0_i32_0 : i32, i32
  }
  func.func @transform_5(%arg0: i32) -> (i32, i32) {
    %c0_i32 = arith.constant 0 : i32
    %c0_i32_0 = arith.constant 0 : i32
    %c0_i32_1 = arith.constant 0 : i32
    return %c0_i32, %c0_i32_0 : i32, i32
  }
  func.func @transform_6(%arg0: i32) -> (i32, i32) {
    %c0_i32 = arith.constant 0 : i32
    %c0_i32_0 = arith.constant 0 : i32
    %c0_i32_1 = arith.constant 0 : i32
    return %c0_i32, %c0_i32_0 : i32, i32
  }
  func.func @transform_7(%arg0: i32) -> (i32, i32) {
    %c0_i32 = arith.constant 0 : i32
    %c0_i32_0 = arith.constant 0 : i32
    return %c0_i32, %arg0 : i32, i32
  }
}

</mosaic_0001>

<bundles_post_ra>
// kernel: agentnet_forward.1
= control target key start
LH: loop header
LB: loop body
LE: loop exit
PB: predicated region body
PF: predicated region fallthrough
CT: control target
= control target key end

     0   :  { %vm98_vm0 = vcmask 130048   ;;  %vm641_vm1 = vmmov 0   ;;  %s766_s1 = inlined_call_operand.vmem [shape: bf16[16,128], index: 1, kind: input, shape index: {}]   ;;  %s767_s0 = inlined_call_operand.vmem [shape: bf16[128,16], index: 0, kind: input, shape index: {}]   ;;  %s768_s3 = inlined_call_operand.vmem [shape: bf16[128,128], index: 3, kind: input, shape index: {}]   ;;  %s769_s2 = inlined_call_operand.vmem [shape: f32[1,128], index: 2, kind: input, shape index: {}]   ;;  %s770_s6 = inlined_call_operand.vmem [shape: f32[8,1], index: 6, kind: input, shape index: {}]   ;;  %s771_s4 = inlined_call_operand.vmem [shape: f32[1,128], index: 4, kind: input, shape index: {}]   ;;  %s772_s5 = inlined_call_operand.vmem [shape: bf16[8,128], index: 5, kind: input, shape index: {}]   ;;  %s773_s7 = inlined_call_operand.vmem [shape: f32[8,128], index: 7, kind: output, shape index: {}]  }
   0x1   :  { %v623_v0 = vld [vmem:[%s766_s1] sm:$0xff]   ;;  %v625_v2 = vld [vmem:[%s767_s0 + $0x8] sm:$0xff]   ;;  %v626_v3 = vld [vmem:[%s767_s0 + $0x10] sm:$0xff]  }
   0x2   :  { %v624_v1 = vld [vmem:[%s767_s0] sm:$0xff]   ;;  %549 = vmatprep.subr.bf16.mxu1 %v623_v0  ;;  %v627_v4 = vld [vmem:[%s767_s0 + $0x18] sm:$0xff]   ;;  %v633_v6 = vld [vmem:[%s768_s3 + $0x30] sm:$0xff]  }
   0x3   :  { %550 = vmatpush3.bf16.msra.mxu1 %v623_v0  ;;  %551 = vmatprep.mubr.msk.bf16.mxu1 %vm98_vm0, %v624_v1  ;;  %v632_v5 = vld [vmem:[%s768_s3 + $0x38] sm:$0xff]   ;;  %v628_v7 = vld [vmem:[%s767_s0 + $0x20] sm:$0xff]   ;;  %v634_v8 = vld [vmem:[%s768_s3 + $0x28] sm:$0xff]  }
   0x4   :  { %567 = vmatprep.subr.bf16.mxu1 %v632_v5  ;;  %v635_v9 = vld [vmem:[%s768_s3 + $0x20] sm:$0xff]   ;;  %v629_v10 = vld [vmem:[%s767_s0 + $0x28] sm:$0xff]   ;;  %v630_v11 = vld [vmem:[%s767_s0 + $0x30] sm:$0xff]  }
   0x5   :  { %v636_v12 = vld [vmem:[%s768_s3 + $0x18] sm:$0xff]   ;;  %v637_v14 = vld [vmem:[%s768_s3 + $0x10] sm:$0xff]   ;;  %v638_v15 = vld [vmem:[%s768_s3 + $0x8] sm:$0xff]  }
   0x6   :  { %552 = vmatmul.mubr.msk.bf16.vlgmr.msra.gmra.mxu1 %vm98_vm0, %v625_v2  ;;  %v631_v13 = vld [vmem:[%s767_s0 + $0x38] sm:$0xff]   ;;  %v639_v16 = vld [vmem:[%s768_s3] sm:$0xff]  }
   0x7   :  { %555 = vmatprep.mubr.msk.bf16.mxu1 %vm98_vm0, %v626_v3  ;;  %568 = vmatpush3.bf16.msra.mxu1 %v632_v5  ;;  %v488_v19 = vld [vmem:[%s769_s2] ss:$0 sm:$0xff] }
   0x8   :  { %569 = vmatprep.subr.bf16.mxu1 %v633_v6 }
   0xb   :  { %570 = vmatpush3.bf16.msra.mxu1 %v633_v6 }
   0xc   :  { %571 = vmatprep.subr.bf16.mxu1 %v634_v8 }
   0xe   :  { %556 = vmatmul.mubr.msk.bf16.gmra.mxu1 %vm98_vm0, %v627_v4 }
   0xf   :  { %559 = vmatprep.mubr.msk.bf16.mxu1 %vm98_vm0, %v628_v7  ;;  %572 = vmatpush3.bf16.msra.mxu1 %v634_v8 }
  0x10   :  { %573 = vmatprep.subr.bf16.mxu1 %v635_v9 }
  0x13   :  { %574 = vmatpush3.bf16.msra.mxu1 %v635_v9 }
  0x14   :  { %575 = vmatprep.subr.bf16.mxu1 %v636_v12 }
  0x16   :  { %560 = vmatmul.mubr.msk.bf16.gmra.mxu1 %vm98_vm0, %v629_v10  ;;  %v640_v10 = vmov 0.0  }
  0x17   :  { %563 = vmatprep.mubr.msk.bf16.mxu1 %vm98_vm0, %v630_v11  ;;  %576 = vmatpush3.bf16.msra.mxu1 %v636_v12  ;;  %v642_v11 = vmov 0   ;;  %v437_v12 = vld [vmem:[%s770_s6] sm:$0xff] }
  0x18   :  { %577 = vmatprep.subr.bf16.mxu1 %v637_v14  ;;  %599 = vmatprep.subr.bf16.mxu0 %v640_v10 }
  0x19   :  { %615 = vmatprep.mubr.msk.bf16.mxu0 %vm641_vm1, %v640_v10  ;;  %622 = vset.pattern.permute.xlu0 %v642_v11 }
  0x1a   :  { %440 = vperm.xlu0 %622, %v437_v12  }
  0x1b   :  { %578 = vmatpush3.bf16.msra.mxu1 %v637_v14  ;;  %v506_v14 = vld [vmem:[%s771_s4] ss:$0 sm:$0xff] }
  0x1c   :  { %579 = vmatprep.subr.bf16.mxu1 %v638_v15 }
  0x1e   :  { %564 = vmatmul.mubr.msk.bf16.gmra.mxu1 %vm98_vm0, %v631_v13 }
  0x1f   :  { %580 = vmatpush3.bf16.msra.mxu1 %v638_v15 }
  0x20   :  { %581 = vmatprep.subr.bf16.mxu1 %v639_v16 }
  0x23   :  { %582 = vmatpush3.bf16.msra.mxu1 %v639_v16 }
  0xc6   :  { %v553_v17 = vpop.f32.mrf.mxu1 }
  0xc7   :  { %v166_v23 = vadd.f32 %v553_v17, %v488_v19 }
  0xc8   :  { %v157_v18 = vpop.f32.mrf.mxu1 }
  0xc9   :  { %v158_v21 = vadd.f32 %v488_v19, %v157_v18  ;;  %v222_v30 = vmax.f32 %v166_v23, 0.0 }
  0xca   :  { %v554_v20 = vpop.f32.mrf.mxu1 }
  0xcb   :  { %v169_v22 = vadd.f32 %v554_v20, %v488_v19  ;;  %v220_v28 = vmax.f32 %v158_v21, 0.0 }
  0xcc   :  { %v160_v24 = vpop.f32.mrf.mxu1 }
  0xcd   :  { %v161_v25 = vadd.f32 %v488_v19, %v160_v24  ;;  %v223_v26 = vmax.f32 %v169_v22, 0.0 }
  0xce   :  { %v557_v27 = vpop.f32.mrf.mxu1 }
  0xcf   :  { %v221_v29 = vmax.f32 %v161_v25, 0.0  ;;  %v237_v33 = vpack.c.bf16 %v223_v26, %v222_v30  ;;  %v182_v37 = vadd.f32 %v557_v27, %v488_v19 }
  0xd0   :  { %v173_v31 = vpop.f32.mrf.mxu1 }
  0xd1   :  { %v236_v32 = vpack.c.bf16 %v221_v29, %v220_v28  ;;  %v174_v35 = vadd.f32 %v488_v19, %v173_v31  ;;  %v226_v44 = vmax.f32 %v182_v37, 0.0 }
  0xd2   :  { %v558_v34 = vpop.f32.mrf.mxu1 }
  0xd3   :  { %v185_v36 = vadd.f32 %v558_v34, %v488_v19  ;;  %583 = vmatprep.mubr.bf16.mxu1 %v236_v32  ;;  %v224_v42 = vmax.f32 %v174_v35, 0.0 }
  0xd4   :  { %v176_v38 = vpop.f32.mrf.mxu1  ;;  %584 = vmatmul.mubr.bf16.vlgmr.msra.gmra.mxu1 %v237_v33 }
  0xd5   :  { %v177_v39 = vadd.f32 %v488_v19, %v176_v38  ;;  %v227_v40 = vmax.f32 %v185_v36, 0.0 }
  0xd6   :  { %v561_v41 = vpop.f32.mrf.mxu1 }
  0xd7   :  { %v225_v43 = vmax.f32 %v177_v39, 0.0  ;;  %v239_v47 = vpack.c.bf16 %v227_v40, %v226_v44  ;;  %v198_v51 = vadd.f32 %v561_v41, %v488_v19 }
  0xd8   :  { %v189_v45 = vpop.f32.mrf.mxu1 }
  0xd9   :  { %v238_v46 = vpack.c.bf16 %v225_v43, %v224_v42  ;;  %v190_v49 = vadd.f32 %v488_v19, %v189_v45  ;;  %v230_v58 = vmax.f32 %v198_v51, 0.0 }
  0xda   :  { %v562_v48 = vpop.f32.mrf.mxu1 }
  0xdb   :  { %v201_v50 = vadd.f32 %v562_v48, %v488_v19  ;;  %587 = vmatprep.mubr.bf16.mxu1 %v238_v46  ;;  %v228_v56 = vmax.f32 %v190_v49, 0.0 }
  0xdc   :  { %v192_v52 = vpop.f32.mrf.mxu1  ;;  %588 = vmatmul.mubr.bf16.gmra.mxu1 %v239_v47 }
  0xdd   :  { %v193_v53 = vadd.f32 %v488_v19, %v192_v52  ;;  %v231_v54 = vmax.f32 %v201_v50, 0.0 }
  0xde   :  { %v565_v55 = vpop.f32.mrf.mxu1 }
  0xdf   :  { %v229_v57 = vmax.f32 %v193_v53, 0.0  ;;  %v241_v61 = vpack.c.bf16 %v231_v54, %v230_v58  ;;  %v214_v1 = vadd.f32 %v565_v55, %v488_v19 }
  0xe0   :  { %v205_v59 = vpop.f32.mrf.mxu1 }
  0xe1   :  { %v240_v60 = vpack.c.bf16 %v229_v57, %v228_v56  ;;  %v206_v63 = vadd.f32 %v488_v19, %v205_v59  ;;  %v234_v7 = vmax.f32 %v214_v1, 0.0 }
  0xe2   :  { %v566_v62 = vpop.f32.mrf.mxu1 }
  0xe3   :  { %v217_v0 = vadd.f32 %v566_v62, %v488_v19  ;;  %591 = vmatprep.mubr.bf16.mxu1 %v240_v60  ;;  %v232_v5 = vmax.f32 %v206_v63, 0.0 }
  0xe4   :  { %v208_v2 = vpop.f32.mrf.mxu1  ;;  %592 = vmatmul.mubr.bf16.gmra.mxu1 %v241_v61 }
  0xe5   :  { %v209_v3 = vadd.f32 %v488_v19, %v208_v2  ;;  %v235_v4 = vmax.f32 %v217_v0, 0.0 }
  0xe7   :  { %v233_v6 = vmax.f32 %v209_v3, 0.0  ;;  %v243_v9 = vpack.c.bf16 %v235_v4, %v234_v7  ;;  %v441_v7 = vpop.permute.xlu0 %440 }
  0xe9   :  { %v242_v8 = vpack.c.bf16 %v233_v6, %v232_v5  ;;  %v428_v6 = vld [vmem:[%s772_s5] sm:$0xf] }
  0xeb   :  { %595 = vmatprep.mubr.bf16.mxu1 %v242_v8 }
  0xec   :  { %596 = vmatmul.mubr.bf16.gmra.mxu1 %v243_v9 }
 0x194   :  { %v585_v13 = vpop.f32.mrf.mxu1 }
 0x195   :  { %v358_v16 = vadd.f32 %v585_v13, %v506_v14 }
 0x196   :  { %v349_v15 = vpop.f32.mrf.mxu1 }
 0x197   :  { %v350_v18 = vadd.f32 %v506_v14, %v349_v15  ;;  %v414_v21 = vmax.f32 %v358_v16, 0.0 }
 0x198   :  { %v586_v17 = vpop.f32.mrf.mxu1 }
 0x199   :  { %v361_v19 = vadd.f32 %v586_v17, %v506_v14  ;;  %v412_v25 = vmax.f32 %v350_v18, 0.0 }
 0x19a   :  { %v352_v20 = vpop.f32.mrf.mxu1 }
 0x19b   :  { %v415_v22 = vmax.f32 %v361_v19, 0.0  ;;  %v353_v23 = vadd.f32 %v506_v14, %v352_v20 }
 0x19c   :  { %v589_v24 = vpop.f32.mrf.mxu1 }
 0x19d   :  { %v430_v26 = vpack.c.bf16 %v415_v22, %v414_v21  ;;  %v413_v27 = vmax.f32 %v353_v23, 0.0  ;;  %v374_v61 = vadd.f32 %v589_v24, %v506_v14 }
 0x19e   :  { %v365_v28 = vpop.f32.mrf.mxu1 }
 0x19f   :  { %v429_v29 = vpack.c.bf16 %v413_v27, %v412_v25  ;;  %v418_v63 = vmax.f32 %v374_v61, 0.0  ;;  %v366_v2 = vadd.f32 %v506_v14, %v365_v28 }
 0x1a0   :  { %v590_v30 = vpop.f32.mrf.mxu1 }
 0x1a1   :  { %v377_v59 = vadd.f32 %v590_v30, %v506_v14  ;;  %v416_v4 = vmax.f32 %v366_v2, 0.0 }
 0x1a2   :  { %v368_v31 = vpop.f32.mrf.mxu1 }
 0x1a3   :  { %v419_v62 = vmax.f32 %v377_v59, 0.0  ;;  %v369_v1 = vadd.f32 %v506_v14, %v368_v31 }
 0x1a4   :  { %v593_v32 = vpop.f32.mrf.mxu1 }
 0x1a5   :  { %v390_v51 = vadd.f32 %v593_v32, %v506_v14  ;;  %v432_v0 = vpack.c.bf16 %v419_v62, %v418_v63  ;;  %v417_v3 = vmax.f32 %v369_v1, 0.0 }
 0x1a6   :  { %v381_v33 = vpop.f32.mrf.mxu1 }
 0x1a7   :  { %v422_v53 = vmax.f32 %v390_v51, 0.0  ;;  %v382_v56 = vadd.f32 %v506_v14, %v381_v33  ;;  %v431_v5 = vpack.c.bf16 %v417_v3, %v416_v4 }
 0x1a8   :  { %v594_v34 = vpop.f32.mrf.mxu1 }
 0x1a9   :  { %v393_v49 = vadd.f32 %v594_v34, %v506_v14  ;;  %v420_v58 = vmax.f32 %v382_v56, 0.0 }
 0x1aa   :  { %v384_v35 = vpop.f32.mrf.mxu1 }
 0x1ab   :  { %v423_v52 = vmax.f32 %v393_v49, 0.0  ;;  %v385_v55 = vadd.f32 %v506_v14, %v384_v35 }
 0x1ac   :  { %v597_v36 = vpop.f32.mrf.mxu1 }
 0x1ad   :  { %v406_v38 = vadd.f32 %v597_v36, %v506_v14  ;;  %v434_v54 = vpack.c.bf16 %v423_v52, %v422_v53  ;;  %v421_v57 = vmax.f32 %v385_v55, 0.0 }
 0x1ae   :  { %v397_v37 = vpop.f32.mrf.mxu1 }
 0x1af   :  { %v426_v42 = vmax.f32 %v406_v38, 0.0  ;;  %v398_v46 = vadd.f32 %v506_v14, %v397_v37  ;;  %v433_v60 = vpack.c.bf16 %v421_v57, %v420_v58 }
 0x1b0   :  { %v598_v39 = vpop.f32.mrf.mxu1 }
 0x1b1   :  { %v409_v40 = vadd.f32 %v598_v39, %v506_v14  ;;  %v424_v48 = vmax.f32 %v398_v46, 0.0 }
 0x1b2   :  { %v400_v41 = vpop.f32.mrf.mxu1 }
 0x1b3   :  { %v427_v43 = vmax.f32 %v409_v40, 0.0  ;;  %v401_v44 = vadd.f32 %v506_v14, %v400_v41 }
 0x1b5   :  { %v436_v45 = vpack.c.bf16 %v427_v43, %v426_v42  ;;  %v425_v47 = vmax.f32 %v401_v44, 0.0 }
 0x1b7   :  { %600 = vmatpush3.bf16.xpose.msra.mxu0 %v436_v45  ;;  %v435_v50 = vpack.c.bf16 %v425_v47, %v424_v48 }
 0x1b8   :  { %601 = vmatprep.subr.bf16.mxu0 %v640_v10 }
 0x1bf   :  { %602 = vmatpush3.bf16.xpose.msra.mxu0 %v435_v50 }
 0x1c0   :  { %603 = vmatprep.subr.bf16.mxu0 %v640_v10 }
 0x1c7   :  { %604 = vmatpush3.bf16.xpose.msra.mxu0 %v434_v54 }
 0x1c8   :  { %605 = vmatprep.subr.bf16.mxu0 %v640_v10 }
 0x1cf   :  { %606 = vmatpush3.bf16.xpose.msra.mxu0 %v433_v60 }
 0x1d0   :  { %607 = vmatprep.subr.bf16.mxu0 %v640_v10 }
 0x1d7   :  { %608 = vmatpush3.bf16.xpose.msra.mxu0 %v432_v0 }
 0x1d8   :  { %609 = vmatprep.subr.bf16.mxu0 %v640_v10 }
 0x1df   :  { %610 = vmatpush3.bf16.xpose.msra.mxu0 %v431_v5 }
 0x1e0   :  { %611 = vmatprep.subr.bf16.mxu0 %v640_v10 }
 0x1e7   :  { %612 = vmatpush3.bf16.xpose.msra.mxu0 %v430_v26 }
 0x1e8   :  { %613 = vmatprep.subr.bf16.mxu0 %v640_v10 }
 0x1ef   :  { %614 = vmatpush3.bf16.xpose.msra.mxu0 %v429_v29 }
 0x1f6   :  { %616 = vmatmul.mubr.bf16.vlgmr.msra.gmra.mxu0 %v428_v6 }
 0x2b6   :  { %v477_v8 = vpop.f32.mrf.mxu0 }
 0x2b7   :  { %v478_v9 = vadd.f32 %v477_v8, %v441_v7 }
 0x2b8   :  { %v617_v11 = vpop.f32.mrf.mxu0 }
 0x2b9   :  { %483 = vst [vmem:[%s773_s7] sm:$0xff] %v478_v9 }
 0x2ba   :  { %v480_v12 = vpop.f32.mrf.mxu0 }
 0x2bc   :  { %v618_v13 = vpop.f32.mrf.mxu0 }

</bundles_post_ra>
